<compile_context>
chip_gen: v7x
topology: tpu7x:2x2x1
jax: 0.10.0
libtpu: 0.0.40
codegen_flags: <defaults>
</compile_context>

<pallas_src>
import functools

import jax
import jax.numpy as jnp
from jax import lax
from jax.experimental import pallas as pl
from jax.experimental.pallas import tpu as pltpu


def _round_up(x, m):
    return (x + m - 1) // m * m


def _cdiv(a, b):
    return (a + b - 1) // b


def _std_maxer_kernel(phases_ref, mask_ref, out_ref, *, kernel_size, stride,
                      padding, t_in, t_out, to_pad):
    """One (batch, channel-block) tile.

    phases_ref: (S, 1, C_blk, To_ph_pad) f32 -- phase-deinterleaved, zero-padded
                x, i.e. phases[s, ..., j] == x_zero_padded[..., j * S + s]
    mask_ref:   (1, 1, To_pad) f32           -- per-batch mask, zero beyond t_out
    out_ref:    (1, C_blk, To_pad)
    """
    K, S, P = kernel_size, stride, padding
    C_blk = out_ref.shape[1]
    NEG = jnp.float32(-1e30)  # TODO(synk): sentinel, not true -inf semantics

    # Load each needed phase stream exactly once (the only HBM x traffic).
    loaded = {}

    def phase(s):
        if s not in loaded:
            loaded[s] = phases_ref[s, 0]          # (C_blk, To_ph_pad)
        return loaded[s]

    col = lax.broadcasted_iota(jnp.int32, (1, to_pad), 1)   # hoisted once

    out_max = jnp.full((C_blk, to_pad), NEG, dtype=jnp.float32)
    out_sum = jnp.zeros((C_blk, to_pad), dtype=jnp.float32)
    for k in range(K):
        d = k // S                                # static left shift for tap k
        v = phase(k % S)
        if d:
            # left-rotate by d lanes (explicit slice+concat == jnp.roll(v, -d));
            # wrapped columns land at j >= t_out and are masked out later.
            v = jnp.concatenate([v[:, d:], v[:, :d]], axis=-1)
        v = v[:, :to_pad]

        # AvgPool1d (count_include_pad=True): zero padding is simply summed.
        out_sum = out_sum + v

        # MaxPool1d uses implicit -inf padding: mask only the statically known
        # boundary taps/columns; interior taps take a bare maximum.
        lo_invalid = max(0, -((k - P) // S))              # ceil((P - k) / S)
        hi_first_invalid = -(-(t_in + P - k) // S)        # first j with src >= T
        conds = []
        if lo_invalid > 0:
            conds.append(col >= lo_invalid)
        if hi_first_invalid < t_out:
            conds.append(col < hi_first_invalid)
        if conds:
            valid = conds[0]
            for c in conds[1:]:
                valid = valid & c
            v = jnp.where(valid, v, NEG)
        out_max = jnp.maximum(out_max, v)

    m = mask_ref[0]                                # (1, To_pad), 0 beyond t_out
    out_max = out_max * m
    out_sum = out_sum * m                          # == K * out_avg

    inv_k = jnp.float32(1.0 / K)
    if t_out <= 1:
        # torch.std of a single element is NaN; NaN > NaN is False -> avg path.
        sel = out_sum * inv_k
    else:
        inv_n = jnp.float32(1.0 / t_out)
        colv = (col < t_out).astype(jnp.float32)   # (1, to_pad) valid-column 0/1

        def _centered_ssq(v):
            # two-pass sum of squared deviations over the t_out valid columns
            mean = jnp.sum(v, axis=-1, keepdims=True) * inv_n
            c = v - mean * colv
            return jnp.sum(c * c, axis=-1, keepdims=True)

        # std(out_max) > std(out_avg)  <=>  ssq(out_max) * K^2 > ssq(out_sum)
        use_max = (_centered_ssq(out_max) * jnp.float32(K * K)
                   > _centered_ssq(out_sum))       # (C_blk, 1) bool
        sel = jnp.where(use_max, out_max, out_sum * inv_k)

    out_ref[0] = sel.astype(out_ref.dtype)


def temporal_std_maxer(x, mask, *, kernel_size, stride, padding):
    """x: (B, C, T) float; mask: (B, 1, T) bool.  Returns (selected, out_mask)."""
    B, C, T = x.shape
    K, S, P = kernel_size, stride, padding
    To = (T + 2 * P - K) // S + 1

    # --- nearest-neighbour mask downsample (F.interpolate 'nearest'), hoisted ---
    if S > 1:
        Tm = T // S
        assert To == Tm, "pool output length must match interpolated mask length"
        idx = (jnp.arange(Tm) * T) // Tm
        mask_ds = jnp.take(mask, idx, axis=-1)                  # (B, 1, To) bool
    else:
        assert To == T, "stride==1 requires pool output length == T"
        mask_ds = mask
    out_mask = mask_ds

    # --- layout: lane-dense To, channels on sublanes, batch as its own grid axis
    To_pad = _round_up(To, 128)
    max_d = (K - 1) // S                            # largest in-kernel lane shift
    To_ph_pad = _round_up(To + max_d, 128)          # >= To_pad always

    # Phase-deinterleaved, zero-padded x: phases[s, b, c, j] = x_pad[b, c, j*S+s].
    # Total size ~= x itself (vs K x To_pad for per-tap materialisation).
    pad_hi = max(To_ph_pad * S - (T + P), 0)
    x_pad = jnp.pad(x.astype(jnp.float32), ((0, 0), (0, 0), (P, pad_hi)))
    phases = jnp.stack(
        [x_pad[:, :, s::S][:, :, :To_ph_pad] for s in range(S)], axis=0)
    # (S, B, C, To_ph_pad)

    # channel-block sizing: ~2 MiB phase block keeps double-buffered inputs +
    # outputs + temporaries well under scoped VMEM on every generation.
    C8 = _round_up(C, 8)
    budget_rows = max(8, (2 * 1024 * 1024) // (S * To_ph_pad * 4) // 8 * 8)
    C_blk = min(C8, budget_rows, 2048)
    # keep the grid >= 2 steps where possible (v7x has 2 TensorCores per chip)
    if B == 1 and C_blk >= C8 and C8 > 8:
        C_blk = _round_up(_cdiv(C8, 2), 8)
    C_pad = _round_up(C8, C_blk)

    phases = jnp.pad(phases, ((0, 0), (0, 0), (0, C_pad - C), (0, 0)))
    # per-batch mask only (no channel broadcast): (B, 1, To_pad), zero beyond To
    mask_cols = jnp.pad(mask_ds.astype(jnp.float32),
                        ((0, 0), (0, 0), (0, To_pad - To)))

    kernel = functools.partial(_std_maxer_kernel, kernel_size=K, stride=S,
                               padding=P, t_in=T, t_out=To, to_pad=To_pad)

    out = pl.pallas_call(
        kernel,
        out_shape=jax.ShapeDtypeStruct((B, C_pad, To_pad), x.dtype),
        grid=(B, C_pad // C_blk),
        in_specs=[
            pl.BlockSpec((S, 1, C_blk, To_ph_pad), lambda b, c: (0, b, c, 0)),
            pl.BlockSpec((1, 1, To_pad), lambda b, c: (b, 0, 0)),
        ],
        out_specs=pl.BlockSpec((1, C_blk, To_pad), lambda b, c: (b, c, 0)),
        compiler_params=pltpu.CompilerParams(
            dimension_semantics=("parallel", "parallel"),
            vmem_limit_bytes=32 * 1024 * 1024,
            allow_input_fusion=[True, True],
        ),
    )(phases, mask_cols)

    sel = out[:, :C, :To]
    return sel, out_mask


def _reference(x, mask, *, kernel_size, stride, padding):
    """Pure-JAX reference matching the PyTorch forward exactly."""
    B, C, T = x.shape
    K, S, P = kernel_size, stride, padding
    To = (T + 2 * P - K) // S + 1
    xp_max = jnp.pad(x, ((0, 0), (0, 0), (P, P)), constant_values=-jnp.inf)
    xp_avg = jnp.pad(x, ((0, 0), (0, 0), (P, P)), constant_values=0.0)
    out_max = jnp.stack([jnp.max(xp_max[:, :, j * S:j * S + K], axis=-1)
                         for j in range(To)], axis=-1)
    out_avg = jnp.stack([jnp.sum(xp_avg[:, :, j * S:j * S + K], axis=-1) / K
                         for j in range(To)], axis=-1)
    if S > 1:
        Tm = T // S
        idx = (jnp.arange(Tm) * T) // Tm
        out_mask = mask.astype(x.dtype)[:, :, idx]
    else:
        out_mask = mask.astype(x.dtype)
    out_max = out_max * out_mask
    out_avg = out_avg * out_mask
    std_max = jnp.std(out_max, axis=-1, ddof=1)
    std_avg = jnp.std(out_avg, axis=-1, ddof=1)
    use_max = (std_max > std_avg)[..., None]
    sel = jnp.where(use_max, out_max, out_avg)
    return sel, out_mask.astype(bool)


if __name__ == "__main__":
    # TemporalStdMaxer(kernel_size=3, stride=2, padding=1, n_embd=4);
    # n_embd is unused in the forward pass, no learnable params.
    K, S, P = 3, 2, 1
    B, C, T = 2, 4, 16

    key = jax.random.PRNGKey(0)
    kx, km = jax.random.split(key)
    x = jax.random.normal(kx, (B, C, T), dtype=jnp.float32)
    lengths = jnp.array([T, T // 2])
    mask = (jnp.arange(T)[None, None, :] < lengths[:, None, None])  # (B,1,T) bool

    sel, out_mask = temporal_std_maxer(x, mask, kernel_size=K, stride=S, padding=P)
    sel = jax.block_until_ready(sel)
    out_mask = jax.block_until_ready(out_mask)

    ref_sel, ref_mask = _reference(x, mask, kernel_size=K, stride=S, padding=P)
    assert jnp.allclose(sel, ref_sel, rtol=1e-5, atol=1e-5), "selected_vector mismatch"
    assert bool(jnp.array_equal(out_mask, ref_mask)), "out_mask mismatch"

    print("KERNEL_OK")
</pallas_src>

<mosaic_0001>
module attributes {stable_mosaic.version = 11 : i64} {
  func.func @_std_maxer_kernel(%arg0: i32, %arg1: i32, %arg2: memref<2x1x8x128xf32, #tpu.memory_space<vmem>>, %arg3: memref<1x1x128xf32, #tpu.memory_space<vmem>>, %arg4: memref<1x8x128xf32, #tpu.memory_space<vmem>>) attributes {dimension_semantics = [#tpu.dimension_semantics<parallel>, #tpu.dimension_semantics<parallel>], iteration_bounds = array<i64: 2, 1>, scalar_prefetch = 0 : i64, scratch_operands = 0 : i64, tpu.core_type = #tpu.core_type<tc>, window_params = [{transform_indices = @transform_0, window_bounds = array<i64: 2, 1, 8, 128>}, {transform_indices = @transform_1, window_bounds = array<i64: 1, 1, 128>}, {transform_indices = @transform_2, window_bounds = array<i64: 1, 8, 128>}]} {
    %0 = tpu.iota {dimensions = array<i32: 1>} : vector<1x128xi32>
    %cst = arith.constant -1.000000e+30 : f32
    %1 = vector.broadcast %cst : f32 to vector<8x128xf32>
    %cst_0 = arith.constant 0.000000e+00 : f32
    %2 = vector.broadcast %cst_0 : f32 to vector<8x128xf32>
    %c0 = arith.constant 0 : index
    %c0_1 = arith.constant 0 : index
    %c0_2 = arith.constant 0 : index
    %c0_3 = arith.constant 0 : index
    %3 = vector.load %arg2[%c0, %c0_1, %c0_2, %c0_3] : memref<2x1x8x128xf32, #tpu.memory_space<vmem>>, vector<1x1x8x128xf32>
    %4 = vector.shape_cast %3 : vector<1x1x8x128xf32> to vector<8x128xf32>
    %5 = arith.addf %2, %4 : vector<8x128xf32>
    %c1_i32 = arith.constant 1 : i32
    %6 = vector.broadcast %c1_i32 : i32 to vector<1x128xi32>
    %7 = arith.cmpi sge, %0, %6 : vector<1x128xi32>
    %cst_4 = arith.constant -1.000000e+30 : f32
    %8 = vector.shape_cast %7 : vector<1x128xi1> to vector<1x128xi1>
    %9 = vector.broadcast %8 : vector<1x128xi1> to vector<8x128xi1>
    %10 = vector.broadcast %cst_4 : f32 to vector<8x128xf32>
    %11 = arith.select %9, %4, %10 : vector<8x128xi1>, vector<8x128xf32>
    %12 = arith.maximumf %1, %11 : vector<8x128xf32>
    %c1 = arith.constant 1 : index
    %c0_5 = arith.constant 0 : index
    %c0_6 = arith.constant 0 : index
    %c0_7 = arith.constant 0 : index
    %13 = vector.load %arg2[%c1, %c0_5, %c0_6, %c0_7] : memref<2x1x8x128xf32, #tpu.memory_space<vmem>>, vector<1x1x8x128xf32>
    %14 = vector.shape_cast %13 : vector<1x1x8x128xf32> to vector<8x128xf32>
    %15 = arith.addf %5, %14 : vector<8x128xf32>
    %16 = arith.maximumf %12, %14 : vector<8x128xf32>
    %17 = vector.extract_strided_slice %4 {offsets = [0, 1], sizes = [8, 127], strides = [1, 1]} : vector<8x128xf32> to vector<8x127xf32>
    %18 = vector.extract_strided_slice %4 {offsets = [0, 0], sizes = [8, 1], strides = [1, 1]} : vector<8x128xf32> to vector<8x1xf32>
    %19 = tpu.concatenate %17, %18 in 1 : vector<8x127xf32>, vector<8x1xf32> -> vector<8x128xf32>
    %20 = arith.addf %15, %19 : vector<8x128xf32>
    %21 = arith.maximumf %16, %19 : vector<8x128xf32>
    %c0_8 = arith.constant 0 : index
    %c0_9 = arith.constant 0 : index
    %c0_10 = arith.constant 0 : index
    %22 = vector.load %arg3[%c0_8, %c0_9, %c0_10] : memref<1x1x128xf32, #tpu.memory_space<vmem>>, vector<1x1x128xf32>
    %23 = vector.shape_cast %22 : vector<1x1x128xf32> to vector<1x128xf32>
    %24 = vector.broadcast %23 : vector<1x128xf32> to vector<8x128xf32>
    %25 = arith.mulf %21, %24 : vector<8x128xf32>
    %26 = vector.broadcast %23 : vector<1x128xf32> to vector<8x128xf32>
    %27 = arith.mulf %20, %26 : vector<8x128xf32>
    %c8_i32 = arith.constant 8 : i32
    %28 = vector.broadcast %c8_i32 : i32 to vector<1x128xi32>
    %29 = arith.cmpi slt, %0, %28 : vector<1x128xi32>
    %30 = arith.extui %29 : vector<1x128xi1> to vector<1x128xi32>
    %31 = arith.sitofp %30 : vector<1x128xi32> to vector<1x128xf32>
    %cst_11 = arith.constant dense<0.000000e+00> : vector<8xf32>
    %32 = vector.multi_reduction <add>, %25, %cst_11 [1] : vector<8x128xf32> to vector<8xf32>
    %33 = vector.shape_cast %32 : vector<8xf32> to vector<8x1xf32>
    %cst_12 = arith.constant 1.250000e-01 : f32
    %34 = vector.broadcast %cst_12 : f32 to vector<8x1xf32>
    %35 = arith.mulf %33, %34 : vector<8x1xf32>
    %36 = vector.broadcast %35 : vector<8x1xf32> to vector<8x128xf32>
    %37 = vector.broadcast %31 : vector<1x128xf32> to vector<8x128xf32>
    %38 = arith.mulf %36, %37 : vector<8x128xf32>
    %39 = arith.subf %25, %38 : vector<8x128xf32>
    %40 = arith.mulf %39, %39 : vector<8x128xf32>
    %cst_13 = arith.constant dense<0.000000e+00> : vector<8xf32>
    %41 = vector.multi_reduction <add>, %40, %cst_13 [1] : vector<8x128xf32> to vector<8xf32>
    %42 = vector.shape_cast %41 : vector<8xf32> to vector<8x1xf32>
    %cst_14 = arith.constant 9.000000e+00 : f32
    %43 = vector.broadcast %cst_14 : f32 to vector<8x1xf32>
    %44 = arith.mulf %42, %43 : vector<8x1xf32>
    %cst_15 = arith.constant dense<0.000000e+00> : vector<8xf32>
    %45 = vector.multi_reduction <add>, %27, %cst_15 [1] : vector<8x128xf32> to vector<8xf32>
    %46 = vector.shape_cast %45 : vector<8xf32> to vector<8x1xf32>
    %cst_16 = arith.constant 1.250000e-01 : f32
    %47 = vector.broadcast %cst_16 : f32 to vector<8x1xf32>
    %48 = arith.mulf %46, %47 : vector<8x1xf32>
    %49 = vector.broadcast %48 : vector<8x1xf32> to vector<8x128xf32>
    %50 = vector.broadcast %31 : vector<1x128xf32> to vector<8x128xf32>
    %51 = arith.mulf %49, %50 : vector<8x128xf32>
    %52 = arith.subf %27, %51 : vector<8x128xf32>
    %53 = arith.mulf %52, %52 : vector<8x128xf32>
    %cst_17 = arith.constant dense<0.000000e+00> : vector<8xf32>
    %54 = vector.multi_reduction <add>, %53, %cst_17 [1] : vector<8x128xf32> to vector<8xf32>
    %55 = vector.shape_cast %54 : vector<8xf32> to vector<8x1xf32>
    %56 = arith.cmpf ogt, %44, %55 : vector<8x1xf32>
    %cst_18 = arith.constant 0.333333343 : f32
    %57 = vector.broadcast %cst_18 : f32 to vector<8x128xf32>
    %58 = arith.mulf %27, %57 : vector<8x128xf32>
    %59 = vector.shape_cast %56 : vector<8x1xi1> to vector<8x1xi1>
    %60 = vector.broadcast %59 : vector<8x1xi1> to vector<8x128xi1>
    %61 = arith.select %60, %25, %58 : vector<8x128xi1>, vector<8x128xf32>
    %c0_19 = arith.constant 0 : index
    %c0_20 = arith.constant 0 : index
    %c0_21 = arith.constant 0 : index
    %62 = vector.load %arg4[%c0_19, %c0_20, %c0_21] : memref<1x8x128xf32, #tpu.memory_space<vmem>>, vector<1x8x128xf32>
    %63 = vector.shape_cast %62 : vector<1x8x128xf32> to vector<8x128xf32>
    %64 = vector.shape_cast %61 : vector<8x128xf32> to vector<1x8x128xf32>
    tpu.vector_store %arg4[%c0_19, %c0_20, %c0_21], %64 {strides = array<i32>} : memref<1x8x128xf32, #tpu.memory_space<vmem>>, vector<1x8x128xf32>,
    return
  }
  func.func @transform_0(%arg0: i32, %arg1: i32) -> (i32, i32, i32, i32) {
    %c0_i32 = arith.constant 0 : i32
    %c0_i32_0 = arith.constant 0 : i32
    %c0_i32_1 = arith.constant 0 : i32
    return %c0_i32, %arg0, %arg1, %c0_i32_0 : i32, i32, i32, i32
  }
  func.func @transform_1(%arg0: i32, %arg1: i32) -> (i32, i32, i32) {
    %c0_i32 = arith.constant 0 : i32
    %c0_i32_0 = arith.constant 0 : i32
    %c0_i32_1 = arith.constant 0 : i32
    return %arg0, %c0_i32, %c0_i32_0 : i32, i32, i32
  }
  func.func @transform_2(%arg0: i32, %arg1: i32) -> (i32, i32, i32) {
    %c0_i32 = arith.constant 0 : i32
    %c0_i32_0 = arith.constant 0 : i32
    return %arg0, %arg1, %c0_i32 : i32, i32, i32
  }
}

</mosaic_0001>

<bundles_post_ra>
// kernel: tpu_custom_call.1
= control target key start
LH: loop header
LB: loop body
LE: loop exit
PB: predicated region body
PF: predicated region fallthrough
CT: control target
= control target key end

     0   :  { %7 = vsyncpa [#allocation3], 0  ;;  %s746_s0 = inlined_call_operand.hbm [shape: f32[2,2,8,128], index: 0, kind: input, shape index: {}]   ;;  %s747_s1 = inlined_call_operand.vmem [shape: f32[2,1,128], index: 1, kind: input, shape index: {}]   ;;  %s748_s2 = inlined_call_operand.hbm [shape: f32[2,8,128], index: 2, kind: output, shape index: {}]  }
   0x1   :  { %9 = vsyncpa [#allocation3 + $0x1], 0 }
   0x2   :  { %10 = vsyncpa [#allocation4], 0 }
   0x3   :  { %12 = vsyncpa [#allocation4 + $0x1], 0  ;;  %s569_s9 = smov 0   ;;  %s571_s10 = smov 0  }
   0x4   :  { %s573_s11 = smov 0   ;;  %s575_s12 = smov 0  }
   0x5   :  { %s577_s13 = smov 0   ;;  %s579_s14 = smov 0  }
   0x6 LB: > { %s350_s15 = sadd.s32 4294967295, %s545_s14   ;;  %s351_s16 = sadd.s32 4294967294, %s545_s14   ;;  %s545_s14 = sphi %s579_s14, %s18_s14   ;;  %s541_s13 = sphi %s577_s13, %s762_s13   ;;  %s537_s12 = sphi %s575_s12, %s761_s12   ;;  %s533_s11 = sphi %s573_s11, %s760_s11   ;;  %s529_s10 = sphi %s571_s10, %s759_s10   ;;  %s525_s9 = sphi %s569_s9, %s758_s9  }
   0x7   : > { %s30_s17 = sadd.s32 1, %s541_s13  ;;  %s39_s18 = sadd.s32 1, %s533_s11 }
   0x8   : > { %p32_p0 = scmp.ge.s32.totalorder %s30_s17, 2  ;;  %p46_p1 = scmp.ne.s32.totalorder %s533_s11, %s529_s10 }
   0x9   : > { %p47_p2 = scmp.eq.s32.totalorder %s545_s14, 0  ;;  %p52_p3 = scmp.ne.s32.totalorder %s529_s10, %s525_s9 }
   0xa   : > { %s764_s17 = smov (%p32_p0, %s30_s17), 0  ;;  %p53_p5 = scmp.eq.s32.totalorder %s350_s15, 0 }
   0xb   : > { %p610_p4 = por %p47_p2, %p46_p1  ;;  %s34_s20 = ssub.s32 %s541_s13, %s764_s17 }
   0xc   : > { %p104_p6 = scmp.eq.s32.totalorder %s350_s15, 1  ;;  %p37_p7 = scmp.eq.s32.totalorder %s34_s20, 0 }
   0xd   : > { %p616_p8 = por %p53_p5, %p52_p3  ;;  %p110_p10 = scmp.eq.s32.totalorder %s351_s16, 1 }
   0xe   : > { %p620_p9 = por %p104_p6, %p46_p1  ;;  %p378_p13 = scmp.lt.s32.totalorder %s545_s14, 2 }
   0xf   : > { %s625_s23 = scalar_select %p37_p7, %s533_s11, %s39_s18  }
  0x10   : > { %s752_s22 = scalar_select %p620_p9, 1, 0 }
  0x11   : > { %p627_p11 = por %p110_p10, %p52_p3  ;;  %s130_s25 = sand.u32 1, %s533_s11  }
  0x12   : > { %s354_s26 = sshll.u32 %s130_s25, 4  ;;  %s355_s27 = sshll.u32 %s541_s13, 7 }
  0x13   : > { %s753_s24 = scalar_select %p627_p11, 1, 0 }
  0x14   : > { %s638_s30 = scalar_lea.hbm %s746_s0, %s355_s27  ;;  %s134_s3 = scalar_lea.vmem [#allocation2], %s354_s26 }
  0x15   : > { %s141_s4 = sshll.u32 %s134_s3, 4  ;;  %p644_p0 = pnand %p378_p13, %p610_p4  ;;  %s640_s4 = int_to_ptr.vmem [resolvable:$true] %s141_s4 }
  0x16   : > { %s648_s6 = scalar_lea.sflag [#allocation3], %s130_s25  ;;  %s433_s7 = scalar_lea.hbm %s638_s30, 256 }
  0x17   : > { %p434_p1 = scmp.ne.s32.totalorder %s638_s30, %s433_s7  ;;  %p435_p2 = pneg %p644_p0 }
  0x18   : > { %s438_s16 = scalar_lea.hbm %s746_s0, 512  ;;  %p439_p4 = scmp.lt.u32.totalorder %s638_s30, %s746_s0 }
  0x19   : > { %p436_p3 = pnand %p435_p2, %p434_p1  ;;  %p440_p6 = scmp.lt.u32.totalorder %s438_s16, %s433_s7 }
  0x1a   : > { %p442_p10 = scmp.lt.u32.totalorder %s433_s7, %s638_s30 }
  0x1b   : > { %p437_p5 = pneg %p436_p3  ;;  %p441_p7 = por %p440_p6, %p439_p4 }
  0x1d   : > { %p443_p13 = por %p442_p10, %p441_p7 }
  0x1f   : > { %p444_p12 = pnand %p443_p13, %p437_p5 }
  0x21   : > { %447 = shalt.err (!%p444_p12)
}
  0x22   : > { %s448_s20 = scalar_lea.vmem %s640_s4, 256  ;;  %s547_s25 = smov [#allocation2]  }
  0x23   : > { %p449_p1 = scmp.ne.s32.totalorder %s640_s4, %s448_s20  ;;  %s453_s26 = sshll.u32 %s547_s25, 4  ;;  %s454_s26 = int_to_ptr.vmem [resolvable:$false] %s453_s26 }
  0x24   : > { %s455_s27 = scalar_lea.vmem %s454_s26, 512  ;;  %p456_p9 = scmp.lt.s32.totalorder %s640_s4, %s454_s26 }
  0x25   : > { %p451_p3 = pnand %p449_p1, %p435_p2  ;;  %p457_p4 = scmp.lt.s32.totalorder %s455_s27, %s448_s20 }
  0x27   : > { %p452_p11 = pneg %p451_p3  ;;  %p458_p6 = por %p457_p4, %p456_p9 }
  0x29   : > { %p459_p7 = pnand %p458_p6, %p452_p11 }
  0x2b   : > { %462 = shalt.err (!%p459_p7)
}
  0x2c   : > { %s548_s28 = smov 256   ;;  %s549_s29 = smov 128  }
  0x2d   : > { %s550_s3 = smov 8   ;;  %p356_p12 = scmp.ge.s32.totalorder %s545_s14, 1 }
  0x2e   : > { %373 = dma.hbm_to_vmem [thread:$0]  (!%p644_p0), %s638_s30, 256, %s640_s4, %s648_s6, %s548_s28, %s549_s29, %s550_s3  }
  0x2f   : > { %p155_p2 = scmp.lt.s32.totalorder %s545_s14, 3 }
  0x31   : > { %p156_p5 = pnand %p356_p12, %p155_p2 }
  0x32   : > { %s679_s7 = sand.u32 (!%p156_p5), 1, %s529_s10  }
  0x33   : > { %159 = sbr.rel (%p156_p5) target bundleno = 491 (0x1eb), region = 28  ;;  %s357_s8 = sshll.u32 (!%p156_p5), %s679_s7, 4 }
  0x34   : > { %s162_s15 = scalar_lea.sflag (!%p156_p5), [#allocation3], %s679_s7  ;;  %s165_s16 = scalar_lea.vmem (!%p156_p5), [#allocation2], %s357_s8 }
  0x3a   : > { %516 = dma.done.wait (%p616_p8), %s162_s15, 256  }
  0x3b   : > { %518 = vsyncadd (%p616_p8), %s162_s15, 4294967040  ;;  %v194_v0 = vld [vmem:[%s165_s16] sm:$0xff]  ;;  %s551_s30 = smov 127   ;;  %v192_v1 = vlaneseq  ;;  %p189_p9 = scmp.lt.s32.totalorder %s537_s12, 1  ;;  %v359_v5 = vld [vmem:[%s165_s16 + $0x8] sm:$0xff]  ;;  %v552_v14 = vmov 0.0  }
  0x3c   : > { %206 = vrot.lane.b32.xlu0 %v194_v0, %s551_s30  ;;  %v203_v6 = vadd.f32 %v359_v5, %v194_v0  ;;  %s358_s21 = sshll.u32 %s679_s7, 3  ;;  %s363_s19 = sshll.u32 %s537_s12, 7 }
  0x3d   : > { %v193_v2 = vand.u32 127, %v192_v1  ;;  %s190_s4 = scalar_select %p189_p9, %s537_s12, 1 }
  0x3e   : > { %s188_s20 = scalar_lea.vmem [#allocation5], %s358_s21  ;;  %s697_s28 = scalar_lea.hbm %s748_s2, %s363_s19 }
  0x3f   : > { %vm196_vm0 = vcmp.ge.s32.totalorder %v193_v2, 1  ;;  %s191_s18 = scalar_lea.vmem %s747_s1, %s190_s4  ;;  %vm220_vm1 = vcmp.lt.s32.totalorder %v193_v2, 8  ;;  %s261_s25 = sshll.u32 %s188_s20, 4  ;;  %s699_s25 = int_to_ptr.vmem [resolvable:$true] %s261_s25 }
  0x40   : > { %v199_v3 = vsel %vm196_vm0, %v194_v0, -1e+30  ;;  %v360_v8 = vld [vmem:[%s191_s18] ss:$0 sm:$0xff]  ;;  %v361_v15 = vsel %vm220_vm1, 1.0, %v552_v14  ;;  %s247_s29 = scalar_lea.sflag [#allocation4], %s679_s7 }
  0x41   : > { %v200_v4 = vmax.f32 %v199_v3, -1e+30  ;;  %s463_s12 = scalar_lea.vmem %s699_s25, 128  ;;  %p755_p11 = scmp.ne.s32.totalorder %s752_s22, 0 }
  0x42   : > { %p464_p8 = scmp.ne.s32.totalorder %s699_s25, %s463_s12  ;;  %s553_s3 = smov [#allocation5]  }
  0x43   : > { %v204_v7 = vmax.f32 %v200_v4, %v359_v5  ;;  %s467_s8 = sshll.u32 %s553_s3, 4  ;;  %s468_s8 = int_to_ptr.vmem [resolvable:$false] %s467_s8 }
  0x44   : > { %p465_p0 = pnand %p464_p8, %p755_p11  ;;  %s469_s15 = scalar_lea.vmem %s468_s8, 256 }
  0x45   : > { %p470_p13 = scmp.lt.s32.totalorder %s699_s25, %s468_s8  ;;  %p471_p1 = scmp.lt.s32.totalorder %s469_s15, %s463_s12 }
  0x46   : > { %p466_p10 = pneg %p465_p0 }
  0x47   : > { %p472_p3 = por %p471_p1, %p470_p13 }
  0x49   : > { %p473_p4 = pnand %p472_p3, %p466_p10 }
  0xae   : > { %v207_v9 = vpop.permute.xlu0 %206 }
  0xaf   : > { %v209_v10 = vadd.f32 %v207_v9, %v203_v6  ;;  %v210_v11 = vmax.f32 %v204_v7, %v207_v9 }
  0xb1   : > { %v218_v12 = vmul.f32 %v360_v8, %v210_v11  ;;  %v219_v13 = vmul.f32 %v360_v8, %v209_v10 }
  0xb3   : > { %232 = vadd.xlane.f32.xlu1 %v219_v13  ;;  %223 = vadd.xlane.f32.xlu0 %v218_v12  ;;  %v241_v28 = vmul.f32 0.33333334, %v219_v13 }
 0x140   : > { %v233_v16 = vpop.xlane.xlu1 %232  ;;  %v224_v17 = vpop.xlane.xlu0 %223 }
 0x141   : > { %v234_v18 = vmul.f32 0.125, %v233_v16  ;;  %v225_v19 = vmul.f32 0.125, %v224_v17 }
 0x143   : > { %v235_v20 = vmul.f32 %v361_v15, %v234_v18  ;;  %v226_v21 = vmul.f32 %v361_v15, %v225_v19 }
 0x145   : > { %v227_v22 = vsub.f32 %v218_v12, %v226_v21  ;;  %v236_v24 = vsub.f32 %v219_v13, %v235_v20 }
 0x147   : > { %v228_v23 = vmul.f32 %v227_v22, %v227_v22  ;;  %v237_v25 = vmul.f32 %v236_v24, %v236_v24 }
 0x149   : > { %229 = vadd.xlane.f32.xlu1 %v228_v23 }
 0x14d   : > { %238 = vadd.xlane.f32.xlu1 %v237_v25 }
 0x1d6   : > { %v230_v26 = vpop.xlane.xlu1 %229 }
 0x1d7   : > { %v231_v27 = vmul.f32 9.0, %v230_v26 }
 0x1da   : > { %v239_v29 = vpop.xlane.xlu1 %238 }
 0x1db   : > { %vm240_vm2 = vcmp.gt.f32.partialorder %v231_v27, %v239_v29 }
 0x1dc   : > { %v244_v30 = vsel %vm240_vm2, %v218_v12, %v241_v28 }
 0x1dd   : > { %245 = vst [vmem:[%s188_s20] sm:$0xff] %v244_v30 }
 0x1de   : > { %476 = shalt.err (!%p473_p4)
}
 0x1df   : > { %s477_s7 = scalar_lea.hbm %s697_s28, 128  ;;  %s481_s4 = scalar_lea.hbm %s748_s2, 256 }
 0x1e0   : > { %p478_p6 = scmp.ne.s32.totalorder %s697_s28, %s477_s7  ;;  %p482_p2 = scmp.lt.u32.totalorder %s697_s28, %s748_s2 }
 0x1e1   : > { %p483_p5 = scmp.lt.u32.totalorder %s481_s4, %s477_s7  ;;  %p485_p8 = scmp.lt.u32.totalorder %s477_s7, %s697_s28 }
 0x1e2   : > { %p479_p7 = pnand %p478_p6, %p755_p11 }
 0x1e3   : > { %p484_p9 = por %p483_p5, %p482_p2 }
 0x1e4   : > { %p480_p12 = pneg %p479_p7 }
 0x1e5   : > { %p486_p0 = por %p485_p8, %p484_p9 }
 0x1e7   : > { %p487_p10 = pnand %p486_p0, %p480_p12 }
 0x1e9   : > { %490 = shalt.err (!%p487_p10)
}
 0x1ea   : > { %368 = dma.vmem_to_hbm [thread:$0]  (%p755_p11), %s699_s25, 128, %s697_s28, %s247_s29  }
 0x1eb PF: > { %s273_s18 = sand.u32 1, %s525_s9   ;;  %p756_p13 = scmp.ne.s32.totalorder %s753_s24, 0 }
 0x1ec   : > { %p757_p1 = scmp.ge.s32.totalorder %s545_s14, 2  ;;  %s274_s21 = scalar_lea.sflag [#allocation4], %s273_s18 }
 0x1ee   : > { %p375_p3 = pnand %p757_p1, %p756_p13 }
 0x1f0   : > { %520 = dma.done.wait (!%p375_p3), %s274_s21, 128  }
 0x1f1   : > { %522 = vsyncadd (!%p375_p3), %s274_s21, 4294967168  ;;  %s18_s14 = sadd.s32 1, %s545_s14   ;;  %s758_s9 = smov %s529_s10 }
 0x1f2   : > { %p15_p4 = scmp.ge.s32.totalorder %s18_s14, 4   ;;  %s759_s10 = smov %s533_s11 }
 0x1f3   : > { %s760_s11 = smov %s625_s23  ;;  %s761_s12 = smov %s541_s13 }
 0x1f4   : > { %s762_s13 = smov %s764_s17  ;;  %17 = sbr.rel (!%p15_p4) target bundleno = 6 (0x6), region = 77 }
 0x1fb   :  { %279 = vsyncpa [#allocation3], 1 }
 0x1fc   :  { %281 = vsyncpa [#allocation3 + $0x1], 1 }
 0x1fd   :  { %282 = vsyncpa [#allocation4], 1 }
 0x1fe   :  { %284 = vsyncpa [#allocation4 + $0x1], 1 }

</bundles_post_ra>
